<compile_context>
chip_gen: v5e
topology: v5e:2x2
jax: 0.10.0
libtpu: 0.0.40
codegen_flags: <defaults>
</compile_context>

<pallas_src>
import jax
import jax.numpy as jnp
from jax.experimental import pallas as pl
from jax.experimental.pallas import tpu as pltpu


# Mirror of the module's `config` property (no Pallas equivalent needed).
IDENTITY_MAP_CONFIG = {"mm_projector_type": "identity"}


def _identity_dma_kernel(x_hbm_ref, o_hbm_ref, sem):
    # One whole-array HBM->HBM DMA: never touches VMEM/vregs or the TC compute
    # units. The DMA engine streams the copy at (near) HBM copy bandwidth.
    cp = pltpu.make_async_copy(x_hbm_ref, o_hbm_ref, sem)
    cp.start()
    cp.wait()


def _identity_copy(x: jax.Array) -> jax.Array:
    """Materialized identity: fresh HBM buffer filled by a single DMA."""
    orig_shape = x.shape
    # Give scalars / 1-D inputs a 2-D rectangular view for the DMA descriptor;
    # higher-rank arrays are copied in their original shape.
    if x.ndim == 0:
        x2 = x.reshape(1, 1)
    elif x.ndim == 1:
        x2 = x.reshape(1, x.shape[0])
    else:
        x2 = x

    out = pl.pallas_call(
        _identity_dma_kernel,
        out_shape=jax.ShapeDtypeStruct(x2.shape, x2.dtype),
        in_specs=[pl.BlockSpec(memory_space=pl.ANY)],   # raw HBM ref, no auto-DMA
        out_specs=pl.BlockSpec(memory_space=pl.ANY),    # raw HBM ref, no auto-DMA
        scratch_shapes=[pltpu.SemaphoreType.DMA],
        # No input_output_aliases: materialize=True must return a fresh buffer.
    )(x2)
    return out.reshape(orig_shape)


def identity_map(x: jax.Array, *args, materialize: bool = False, **kwargs) -> jax.Array:
    """Pallas equivalent of IdentityMap.forward: returns x unchanged.

    Default (fast) path returns x directly — zero HBM traffic, matching the
    PyTorch module's semantics exactly. Set materialize=True to force a fresh
    output buffer via a single HBM->HBM DMA copy (done for every size; the
    launch cost is the caller's explicit choice).
    """
    if not materialize:
        return x
    return _identity_copy(x)


if __name__ == "__main__":
    key = jax.random.PRNGKey(0)
    k1, k2, k3 = jax.random.split(key, 3)

    # 1) Projector-style input [batch=2, seq=8, hidden=32]: default fast path.
    x_small = jax.random.normal(k1, (2, 8, 32), dtype=jnp.float32)
    y_small = jax.block_until_ready(identity_map(x_small))
    assert y_small.shape == x_small.shape and y_small.dtype == x_small.dtype
    assert bool(jnp.all(y_small == x_small))

    # 2) Materialized copy (fresh buffer) via HBM->HBM DMA, small f32 activation.
    x_f32 = jax.random.normal(k2, (2, 64, 128), dtype=jnp.float32)
    y_f32 = jax.block_until_ready(identity_map(x_f32, materialize=True))
    assert y_f32.shape == x_f32.shape and y_f32.dtype == x_f32.dtype
    assert bool(jnp.all(y_f32 == x_f32))

    # 3) bf16 input: same DMA path, dtype-agnostic.
    x_bf16 = jax.random.normal(k3, (2, 8, 32), dtype=jnp.float32).astype(jnp.bfloat16)
    y_bf16 = jax.block_until_ready(identity_map(x_bf16, materialize=True))
    assert y_bf16.shape == x_bf16.shape and y_bf16.dtype == x_bf16.dtype
    assert bool(jnp.all(y_bf16 == x_bf16))

    # 4) 1-D, non-multiple-of-128 size: reshaped to (1, N) for the DMA, then back.
    x_1d = jnp.arange(100, dtype=jnp.int32)
    y_1d = jax.block_until_ready(identity_map(x_1d, materialize=True))
    assert y_1d.shape == x_1d.shape and y_1d.dtype == x_1d.dtype
    assert bool(jnp.all(y_1d == x_1d))

    assert IDENTITY_MAP_CONFIG["mm_projector_type"] == "identity"
    print("KERNEL_OK")
</pallas_src>

<mosaic_0001>
module attributes {stable_mosaic.version = 11 : i64} {
  func.func @_identity_dma_kernel(%arg0: memref<2x64x128xf32, #tpu.memory_space<any>>, %arg1: memref<2x64x128xf32, #tpu.memory_space<any>>, %arg2: memref<!tpu.dma_semaphore, #tpu.memory_space<semaphore_mem>>) attributes {dimension_semantics = [], scalar_prefetch = 0 : i64, scratch_operands = 1 : i64, tpu.core_type = #tpu.core_type<tc>} {
    tpu.enqueue_dma source(%arg0 : memref<2x64x128xf32, #tpu.memory_space<any>>) target(%arg1 : memref<2x64x128xf32, #tpu.memory_space<any>>) target_semaphore(%arg2 : memref<!tpu.dma_semaphore, #tpu.memory_space<semaphore_mem>>)
    tpu.wait_dma2 semaphore(%arg2 : memref<!tpu.dma_semaphore, #tpu.memory_space<semaphore_mem>>) src(%arg0 : memref<2x64x128xf32, #tpu.memory_space<any>>) dst(%arg1 : memref<2x64x128xf32, #tpu.memory_space<any>>)
    return
  }
}

</mosaic_0001>

<bundles_post_ra>
// kernel: tpu_custom_call.1
= control target key start
LH: loop header
LB: loop body
LE: loop exit
PB: predicated region body
PF: predicated region fallthrough
CT: control target
= control target key end

     0   :  { %s33_s12 = smov [#allocation2]   ;;  %s34_s13 = smov [#allocation3]   ;;  %s52_s0 = inlined_call_operand.hbm [shape: f32[2,64,128], index: 0, kind: input, shape index: {}]   ;;  %s53_s1 = inlined_call_operand.hbm [shape: f32[2,64,128], index: 1, kind: output, shape index: {}]  }
   0x1   :  { %s10_s8 = sshll.u32 %s52_s0, 4  ;;  %s12_s11 = sshll.u32 %s53_s1, 4  ;;  %s11_s8 = int_to_ptr.hbm [resolvable:$true] %s10_s8  ;;  %s13_s11 = int_to_ptr.hbm [resolvable:$true] %s12_s11 }
   0x2   :  { %s35_s14 = smov 0  }
   0x3   :  { %16 = dma.general %s11_s8, 2048, %s13_s11, %s33_s12, %s34_s13, [#allocation4], %s35_s14, 0  }
   0x4   :  { %31 = dma.done.wait [#allocation2], 2048 }
   0x5   :  { %32 = vsyncadd [#allocation2], 4294965248 }
   0x6   :  { %21 = vsyncmov [#allocation2] }
   0x9   :  { %s22_s15 = vpop.sfrf %21 }
   0xa   :  { %p27_p0 = scmp.ne.s32.totalorder %s22_s15, 0 }
   0xc   :  { %26 = shalt.err (%p27_p0)  }

</bundles_post_ra>
